<compile_context>
chip_gen: v7x
topology: tpu7x:2x2x1
jax: 0.10.0
libtpu: 0.0.40
codegen_flags: <defaults>
</compile_context>

<pallas_src>
import jax
import jax.numpy as jnp
from jax.experimental import pallas as pl
from jax.experimental.pallas import tpu as pltpu

N_EMBD = 384          # fixed by the module
BLOCK_SIZE = 256      # causal mask buffer size (T must be <= BLOCK_SIZE)


def _head_kernel(x_ref, w_ref, bias_ref, o_ref):
    # x_ref:    (Bb, T, C)    activations for Bb batch elements
    # w_ref:    (C, 3*Hpad)   fused slot-padded [Wk|0 | Wq*scale|0 | Wv|0], bf16
    # bias_ref: (T, T)        additive causal bias (0 / -inf), resident across steps
    # o_ref:    (1, Bb, T*H)  lane-dense output slab
    Bb, T, C = x_ref.shape
    Hpad = w_ref.shape[1] // 3
    H = o_ref.shape[2] // T

    # ---- Fused QKV projection: one wide bf16 MXU pass (M=Bb*T, N=3*Hpad), f32 acc ----
    x2 = x_ref[...].reshape(Bb * T, C).astype(jnp.bfloat16)
    kqv = jnp.dot(x2, w_ref[...], preferred_element_type=jnp.float32)   # (Bb*T, 3*Hpad)
    kqv = kqv.reshape(Bb, T, 3 * Hpad)

    # Slot-padded layout: every slice below starts at lane 0 of a 128-lane boundary,
    # so no XLU lane rotation / relayout copy is required.
    k = kqv[:, :, :Hpad].astype(jnp.bfloat16)                 # cols >= H are zero
    q = kqv[:, :, Hpad:2 * Hpad].astype(jnp.bfloat16)         # C**-0.5 folded into Wq
    v = kqv[:, :, 2 * Hpad:2 * Hpad + H].astype(jnp.bfloat16)

    # ---- Scores: contract (padded) head dim directly; zero pad columns add 0 ----
    s = jnp.einsum("bqh,bkh->bqk", q, k,
                   preferred_element_type=jnp.float32)                  # (Bb, T, T)
    s = s + bias_ref[...][None, :, :]

    # ---- Numerically stable softmax; reciprocal on the EUP ----
    m = jnp.max(s, axis=-1, keepdims=True)
    e = jnp.exp(s - m)
    denom = jnp.sum(e, axis=-1, keepdims=True)
    p = e * pl.reciprocal(denom, approx=True)

    # ---- Weighted sum of values (bf16 operands, f32 accumulation) ----
    out = jnp.einsum("bqk,bkh->bqh", p.astype(jnp.bfloat16), v,
                     preferred_element_type=jnp.float32)                # (Bb, T, H)

    # Lane-dense store: collapse (T, H) -> (T*H,) so the output writeback uses
    # full-width unmasked vector stores instead of 64-lane masked stores.
    o_ref[...] = out.astype(o_ref.dtype).reshape(1, Bb, T * H)


def _has_two_tensorcores():
    """True on chips whose grid 'parallel' axes shard across 2 TensorCores (v7x-class).
    On single-TC chips (v5e / v6e) the grid is a purely serial loop, so there is no
    point forcing >= 2 grid steps."""
    try:
        kind = jax.devices()[0].device_kind.lower()
    except Exception:
        return True  # unknown: be safe, at worst halves the tile
    single_tc = any(tag in kind for tag in
                    ("v5 lite", "v5e", "v5litepod", "v6 lite", "v6e"))
    return not single_tc


def _pick_block_batch(B, T, C, H, Hpad, x_itemsize,
                      vmem_budget_bytes=20 << 20, want_two_steps=None):
    """Largest batch-block Bb dividing B whose estimated per-step VMEM footprint fits
    the budget.  Only requires >= 2 grid steps on dual-TensorCore chips."""
    if want_two_steps is None:
        want_two_steps = _has_two_tensorcores()

    # Rough per-batch-element VMEM footprint (double-buffered I/O blocks + main temps).
    per_b = (
        2 * T * C * x_itemsize          # x block (double-buffered)
        + 2 * T * H * x_itemsize        # flat output block (double-buffered)
        + 2 * T * T * 4                 # f32 scores + exp
        + T * T * 2                     # bf16 probabilities
        + T * C * 2                     # bf16 x slab
        + T * 3 * Hpad * 4              # f32 fused kqv
        + 2 * T * Hpad * 2 + T * H * 2  # bf16 k, q, v
        + T * H * 4                     # f32 out before store
    )
    fixed = C * 3 * Hpad * 2 + T * T * 4            # fused weight + bias (resident)
    budget = max(vmem_budget_bytes - fixed, per_b)

    divisors = [d for d in range(1, B + 1) if B % d == 0]
    fitting = [d for d in divisors if d * per_b <= budget] or [1]
    best = max(fitting)
    if want_two_steps:
        two_step = [d for d in fitting if B // d >= 2]
        if two_step:
            best = max(two_step)
    return best


def head_forward(x, w_key, w_query, w_value, block_batch=None):
    """x: (B, T, C) f32 or bf16.  w_*: PyTorch-style (head_size, n_embd) weights."""
    B, T, C = x.shape
    assert C == N_EMBD and T <= BLOCK_SIZE
    H = w_key.shape[0]
    assert (T * H) % 128 == 0, "lane-dense output path needs T*H to be a multiple of 128"

    # Pad each QKV slot to a 128-lane boundary; fold the C**-0.5 scale into Wq.
    Hpad = ((H + 127) // 128) * 128
    scale = jnp.float32(C) ** -0.5

    def _slot(w, s=None):
        wt = w.T.astype(jnp.float32)                 # (C, H)
        if s is not None:
            wt = wt * s
        return jnp.pad(wt, ((0, 0), (0, Hpad - H)))  # (C, Hpad), zero-padded columns

    wkqv = jnp.concatenate([_slot(w_key), _slot(w_query, scale), _slot(w_value)], axis=1)
    wkqv = wkqv.astype(jnp.bfloat16)                 # (C, 3*Hpad)

    # Additive causal bias, built once on the host and DMA'd once (constant index_map).
    tril = jnp.tril(jnp.ones((T, T), dtype=bool))
    bias = jnp.where(tril, 0.0, -jnp.inf).astype(jnp.float32)

    Bb = (_pick_block_batch(B, T, C, H, Hpad, jnp.dtype(x.dtype).itemsize)
          if block_batch is None else block_batch)
    assert B % Bb == 0
    G = B // Bb

    # TODO(synk): for B == 1 on v7x a second "parallel" grid axis over query tiles
    # would keep both TensorCores busy; omitted here for simplicity.
    out_flat = pl.pallas_call(
        _head_kernel,
        out_shape=jax.ShapeDtypeStruct((G, Bb, T * H), x.dtype),
        grid_spec=pltpu.PrefetchScalarGridSpec(
            num_scalar_prefetch=0,
            grid=(G,),
            in_specs=[
                pl.BlockSpec((Bb, T, C), lambda g: (g, 0, 0)),     # x, Bb batches/step
                pl.BlockSpec((C, 3 * Hpad), lambda g: (0, 0)),     # fused QKV weight
                pl.BlockSpec((T, T), lambda g: (0, 0)),            # causal bias
            ],
            out_specs=pl.BlockSpec((1, Bb, T * H), lambda g: (g, 0, 0)),
        ),
        compiler_params=pltpu.CompilerParams(
            dimension_semantics=("parallel",),
            vmem_limit_bytes=48 << 20,   # > v5e's 16 MiB default, < v7x's 64 MiB physical
        ),
    )(x, wkqv, bias)

    # Free reshape back to (B, T, H): the flat layout is exactly row-major order.
    return out_flat.reshape(B, T, H)


def head_reference(x, w_key, w_query, w_value):
    """Pure-JAX f32 reference mirroring the PyTorch forward exactly."""
    B, T, C = x.shape
    k = jnp.einsum("btc,hc->bth", x, w_key)
    q = jnp.einsum("btc,hc->bth", x, w_query)
    v = jnp.einsum("btc,hc->bth", x, w_value)
    w = jnp.einsum("bth,bsh->bts", q, k) * (C ** -0.5)
    tril = jnp.tril(jnp.ones((T, T), dtype=bool))
    w = jnp.where(tril, w, -jnp.inf)
    w = jax.nn.softmax(w, axis=-1)
    return jnp.einsum("bts,bsh->bth", w, v)


if __name__ == "__main__":
    B, T, C = 4, 32, N_EMBD      # small shapes consistent with the module
    head_size = 64

    key = jax.random.PRNGKey(0)
    kx, kk, kq, kv = jax.random.split(key, 4)

    x = jax.random.normal(kx, (B, T, C), dtype=jnp.float32)
    # Deterministic "Linear(n_embd, head_size, bias=False)" weights, (out, in).
    w_key_p = jax.random.normal(kk, (head_size, C), dtype=jnp.float32) * (C ** -0.5)
    w_query_p = jax.random.normal(kq, (head_size, C), dtype=jnp.float32) * (C ** -0.5)
    w_value_p = jax.random.normal(kv, (head_size, C), dtype=jnp.float32) * (C ** -0.5)

    out = head_forward(x, w_key_p, w_query_p, w_value_p)
    out = jax.block_until_ready(out)

    ref = head_reference(x, w_key_p, w_query_p, w_value_p)
    assert out.shape == (B, T, head_size)
    # bf16 MXU operands + approx reciprocal -> loosened tolerance vs f32 reference.
    assert jnp.allclose(out, ref, atol=2e-2, rtol=2e-2), "mismatch vs reference"

    print("KERNEL_OK")
</pallas_src>

<mosaic_0001>
module attributes {stable_mosaic.version = 11 : i64} {
  func.func @_head_kernel(%arg0: i32, %arg1: memref<2x32x384xf32, #tpu.memory_space<vmem>>, %arg2: memref<384x384xbf16, #tpu.memory_space<vmem>>, %arg3: memref<32x32xf32, #tpu.memory_space<vmem>>, %arg4: memref<1x2x2048xf32, #tpu.memory_space<vmem>>) attributes {dimension_semantics = [#tpu.dimension_semantics<parallel>], iteration_bounds = array<i64: 2>, scalar_prefetch = 0 : i64, scratch_operands = 0 : i64, tpu.core_type = #tpu.core_type<tc>, window_params = [{transform_indices = @transform_0, window_bounds = array<i64: 2, 32, 384>}, {pipeline_mode = #tpu.pipeline_mode<synchronous>, transform_indices = @transform_1, window_bounds = array<i64: 384, 384>}, {pipeline_mode = #tpu.pipeline_mode<synchronous>, transform_indices = @transform_2, window_bounds = array<i64: 32, 32>}, {transform_indices = @transform_3, window_bounds = array<i64: 1, 2, 2048>}]} {
    %c0 = arith.constant 0 : index
    %c0_0 = arith.constant 0 : index
    %c0_1 = arith.constant 0 : index
    %0 = vector.load %arg1[%c0, %c0_0, %c0_1] : memref<2x32x384xf32, #tpu.memory_space<vmem>>, vector<2x32x384xf32>
    %1 = vector.shape_cast %0 : vector<2x32x384xf32> to vector<64x384xf32>
    %2 = arith.truncf %1 : vector<64x384xf32> to vector<64x384xbf16>
    %c0_2 = arith.constant 0 : index
    %c0_3 = arith.constant 0 : index
    %3 = vector.load %arg2[%c0_2, %c0_3] : memref<384x384xbf16, #tpu.memory_space<vmem>>, vector<384x384xbf16>
    %cst = arith.constant dense<0.000000e+00> : vector<64x384xf32>
    %4 = tpu.matmul %2, %3, %cst {dimension_numbers = #tpu.dot_dimension_numbers<[1], [0], [0], [1], [0, 0, 1, 1], [], []>} : vector<64x384xbf16>, vector<384x384xbf16>, vector<64x384xf32> -> vector<64x384xf32>
    %5 = vector.shape_cast %4 : vector<64x384xf32> to vector<2x32x384xf32>
    %6 = vector.extract_strided_slice %5 {offsets = [0, 0, 0], sizes = [2, 32, 128], strides = [1, 1, 1]} : vector<2x32x384xf32> to vector<2x32x128xf32>
    %7 = arith.truncf %6 : vector<2x32x128xf32> to vector<2x32x128xbf16>
    %8 = vector.extract_strided_slice %5 {offsets = [0, 0, 128], sizes = [2, 32, 128], strides = [1, 1, 1]} : vector<2x32x384xf32> to vector<2x32x128xf32>
    %9 = arith.truncf %8 : vector<2x32x128xf32> to vector<2x32x128xbf16>
    %10 = vector.extract_strided_slice %5 {offsets = [0, 0, 256], sizes = [2, 32, 64], strides = [1, 1, 1]} : vector<2x32x384xf32> to vector<2x32x64xf32>
    %11 = arith.truncf %10 : vector<2x32x64xf32> to vector<2x32x64xbf16>
    "tpu.trace_start"() <{level = 10 : i32, message = "bqh,bkh->bqk"}> : () -> ()
    %cst_4 = arith.constant dense<0.000000e+00> : vector<2x32x32xf32>
    %12 = tpu.matmul %9, %7, %cst_4 {dimension_numbers = #tpu.dot_dimension_numbers<[2], [2], [1], [1], [0, 0, 0, 1, 1, 1], [0], [0]>} : vector<2x32x128xbf16>, vector<2x32x128xbf16>, vector<2x32x32xf32> -> vector<2x32x32xf32>
    "tpu.trace_stop"() : () -> ()
    %c0_5 = arith.constant 0 : index
    %c0_6 = arith.constant 0 : index
    %13 = vector.load %arg3[%c0_5, %c0_6] : memref<32x32xf32, #tpu.memory_space<vmem>>, vector<32x32xf32>
    %14 = vector.shape_cast %13 : vector<32x32xf32> to vector<1x32x32xf32>
    %15 = vector.broadcast %14 : vector<1x32x32xf32> to vector<2x32x32xf32>
    %16 = arith.addf %12, %15 : vector<2x32x32xf32>
    %cst_7 = arith.constant dense<0xFF800000> : vector<2x32xf32>
    %17 = vector.multi_reduction <maximumf>, %16, %cst_7 [2] : vector<2x32x32xf32> to vector<2x32xf32>
    %18 = vector.shape_cast %17 : vector<2x32xf32> to vector<2x32x1xf32>
    %19 = vector.broadcast %18 : vector<2x32x1xf32> to vector<2x32x32xf32>
    %20 = arith.subf %16, %19 : vector<2x32x32xf32>
    %21 = math.exp %20 : vector<2x32x32xf32>
    %cst_8 = arith.constant dense<0.000000e+00> : vector<2x32xf32>
    %22 = vector.multi_reduction <add>, %21, %cst_8 [2] : vector<2x32x32xf32> to vector<2x32xf32>
    %23 = vector.shape_cast %22 : vector<2x32xf32> to vector<2x32x1xf32>
    %24 = tpu.reciprocal %23 {approx = true} : vector<2x32x1xf32> -> vector<2x32x1xf32>
    %25 = vector.broadcast %24 : vector<2x32x1xf32> to vector<2x32x32xf32>
    %26 = arith.mulf %21, %25 : vector<2x32x32xf32>
    %27 = arith.truncf %26 : vector<2x32x32xf32> to vector<2x32x32xbf16>
    "tpu.trace_start"() <{level = 10 : i32, message = "bqk,bkh->bqh"}> : () -> ()
    %cst_9 = arith.constant dense<0.000000e+00> : vector<2x32x64xf32>
    %28 = tpu.matmul %27, %11, %cst_9 {dimension_numbers = #tpu.dot_dimension_numbers<[2], [1], [1], [2], [0, 0, 0, 1, 1, 2], [0], [0]>} : vector<2x32x32xbf16>, vector<2x32x64xbf16>, vector<2x32x64xf32> -> vector<2x32x64xf32>
    "tpu.trace_stop"() : () -> ()
    %29 = vector.shape_cast %28 : vector<2x32x64xf32> to vector<1x2x2048xf32>
    %c0_10 = arith.constant 0 : index
    %c0_11 = arith.constant 0 : index
    %c0_12 = arith.constant 0 : index
    %30 = vector.load %arg4[%c0_10, %c0_11, %c0_12] : memref<1x2x2048xf32, #tpu.memory_space<vmem>>, vector<1x2x2048xf32>
    tpu.vector_store %arg4[%c0_10, %c0_11, %c0_12], %29 {strides = array<i32>} : memref<1x2x2048xf32, #tpu.memory_space<vmem>>, vector<1x2x2048xf32>,
    return
  }
  func.func @transform_0(%arg0: i32) -> (i32, i32, i32) {
    %c0_i32 = arith.constant 0 : i32
    %c0_i32_0 = arith.constant 0 : i32
    %c0_i32_1 = arith.constant 0 : i32
    return %arg0, %c0_i32, %c0_i32_0 : i32, i32, i32
  }
  func.func @transform_1(%arg0: i32) -> (i32, i32) {
    %c0_i32 = arith.constant 0 : i32
    %c0_i32_0 = arith.constant 0 : i32
    %c0_i32_1 = arith.constant 0 : i32
    return %c0_i32, %c0_i32_0 : i32, i32
  }
  func.func @transform_2(%arg0: i32) -> (i32, i32) {
    %c0_i32 = arith.constant 0 : i32
    %c0_i32_0 = arith.constant 0 : i32
    %c0_i32_1 = arith.constant 0 : i32
    return %c0_i32, %c0_i32_0 : i32, i32
  }
  func.func @transform_3(%arg0: i32) -> (i32, i32, i32) {
    %c0_i32 = arith.constant 0 : i32
    %c0_i32_0 = arith.constant 0 : i32
    %c0_i32_1 = arith.constant 0 : i32
    return %arg0, %c0_i32, %c0_i32_0 : i32, i32, i32
  }
}

</mosaic_0001>

<bundles_post_ra>
// kernel: tpu_custom_call.1
= control target key start
LH: loop header
LB: loop body
LE: loop exit
PB: predicated region body
PF: predicated region fallthrough
CT: control target
= control target key end

     0   :  { %8 = vsyncpa [#allocation3], 0  ;;  %s2941_s0 = inlined_call_operand.hbm [shape: f32[4,32,384], index: 0, kind: input, shape index: {}]   ;;  %s2942_s1 = inlined_call_operand.hbm [shape: bf16[384,384], index: 1, kind: input, shape index: {}]   ;;  %s2943_s2 = inlined_call_operand.hbm [shape: f32[32,32], index: 2, kind: input, shape index: {}]   ;;  %s2944_s3 = inlined_call_operand.hbm [shape: f32[2,2,2048], index: 3, kind: output, shape index: {}]  }
   0x1   :  { %10 = vsyncpa [#allocation3 + $0x1], 0 }
   0x2   :  { %11 = vsyncpa [#allocation6], 0 }
   0x3   :  { %12 = vsyncpa [#allocation4], 0 }
   0x4   :  { %14 = vsyncpa [#allocation4 + $0x1], 0  ;;  %s2507_s12 = smov 0   ;;  %s2509_s13 = smov 0  }
   0x5   :  { %s2511_s14 = smov 0   ;;  %s2513_s15 = smov 0  }
   0x6 LB: > { %s2528_s16 = sadd.s32 4294967295, %s2470_s15   ;;  %s1871_s17 = sadd.s32 4294967294, %s2470_s15   ;;  %s2470_s15 = sphi %s2513_s15, %s2964_s15   ;;  %s2466_s14 = sphi %s2511_s14, %s2963_s14   ;;  %s2462_s13 = sphi %s2509_s13, %s2962_s13   ;;  %s2458_s12 = sphi %s2507_s12, %s2961_s12  }
   0x7   : > { %p40_p0 = scmp.ne.s32.totalorder %s2462_s13, %s2458_s12  ;;  %p2945_p1 = scmp.eq.s32.totalorder %s2528_s16, 0 }
   0x8   : > { %p112_p3 = scmp.eq.s32.totalorder %s1871_s17, 1  ;;  %p1872_p5 = scmp.ge.s32.totalorder %s2470_s15, 1 }
   0x9   : > { %p2537_p4 = por %p2945_p1, %p40_p0  ;;  %p119_p7 = scmp.lt.s32.totalorder %s2470_s15, 3 }
   0xa   : > { %p2542_p6 = por %p112_p3, %p40_p0  ;;  %s2472_s21 = smov [#allocation5]  }
   0xb   : > { %s2948_s18 = scalar_select %p2537_p4, 1, 0 }
   0xc   : > { %s2949_s19 = scalar_select %p2542_p6, 1, 0 }
   0xd   : > { %p2547_p8 = pnand %p1872_p5, %p119_p7  ;;  %s131_s22 = sshll.u32 %s2472_s21, 4  ;;  %s2551_s22 = int_to_ptr.vmem [resolvable:$true] %s131_s22 }
   0xe   : > { %s2473_s24 = smov [#allocation7]   ;;  %s2314_s28 = scalar_lea.hbm %s2942_s1, 9216 }
   0xf   : > { %p2120_p9 = pneg %p2547_p8  ;;  %s144_s25 = sshll.u32 %s2473_s24, 4  ;;  %s2562_s25 = int_to_ptr.vmem [resolvable:$true] %s144_s25 }
  0x10   : > { %p2315_p12 = scmp.ne.s32.totalorder %s2942_s1, %s2314_s28  ;;  %p2321_p5 = scmp.lt.u32.totalorder %s2314_s28, %s2942_s1 }
  0x11   : > { %p2558_p11 = pnand %p2120_p9, %p2945_p1 }
  0x13   : > { %p2316_p13 = pneg %p2558_p11 }
  0x15   : > { %p2317_p0 = pnand %p2316_p13, %p2315_p12 }
  0x17   : > { %p2318_p3 = pneg %p2317_p0 }
  0x19   : > { %p2323_p7 = pnand %p2321_p5, %p2318_p3 }
  0x1b   : > { %2326 = shalt.err (!%p2323_p7)
}
  0x1c   : > { %s2327_s6 = scalar_lea.vmem %s2551_s22, 9216  ;;  %p2335_p2 = scmp.lt.s32.totalorder %s2551_s22, %s2551_s22 }
  0x1d   : > { %p2328_p9 = scmp.ne.s32.totalorder %s2551_s22, %s2327_s6  ;;  %p2336_p12 = scmp.lt.s32.totalorder %s2327_s6, %s2327_s6 }
  0x1f   : > { %p2330_p10 = pnand %p2328_p9, %p2316_p13  ;;  %p2337_p0 = por %p2336_p12, %p2335_p2 }
  0x21   : > { %p2331_p1 = pneg %p2330_p10 }
  0x23   : > { %p2338_p6 = pnand %p2337_p0, %p2331_p1 }
  0x25   : > { %2341 = shalt.err (!%p2338_p6)
}
  0x26   : > { %s2474_s7 = smov 192   ;;  %s2475_s8 = smov 12  }
  0x27   : > { %2123 = dma.hbm_to_vmem [thread:$0]  (!%p2558_p11), %s2942_s1, 9216, %s2551_s22, [#allocation6], %s2474_s7, %s2474_s7, %s2475_s8  }
  0x28   : > { %s2342_s21 = scalar_lea.hbm %s2943_s2, 512 }
  0x29   : > { %p2343_p2 = scmp.ne.s32.totalorder %s2943_s2, %s2342_s21  ;;  %p2349_p10 = scmp.lt.u32.totalorder %s2342_s21, %s2943_s2 }
  0x2b   : > { %p2345_p1 = pnand %p2343_p2, %p2316_p13 }
  0x2d   : > { %p2346_p6 = pneg %p2345_p1 }
  0x2f   : > { %p2351_p3 = pnand %p2349_p10, %p2346_p6 }
  0x31   : > { %2354 = shalt.err (!%p2351_p3)
}
  0x32   : > { %s2355_s22 = scalar_lea.vmem %s2562_s25, 512  ;;  %p2363_p12 = scmp.lt.s32.totalorder %s2562_s25, %s2562_s25 }
  0x33   : > { %p2356_p5 = scmp.ne.s32.totalorder %s2562_s25, %s2355_s22  ;;  %p2364_p0 = scmp.lt.s32.totalorder %s2355_s22, %s2355_s22 }
  0x35   : > { %p2358_p7 = pnand %p2356_p5, %p2316_p13  ;;  %p2365_p2 = por %p2364_p0, %p2363_p12 }
  0x37   : > { %p2359_p9 = pneg %p2358_p7 }
  0x39   : > { %p2366_p1 = pnand %p2365_p2, %p2359_p9 }
  0x3b   : > { %2369 = shalt.err (!%p2366_p1)
}
  0x3c   : > { %s2476_s29 = smov 128   ;;  %s2477_s30 = smov 8  }
  0x3d   : > { %2126 = dma.hbm_to_vmem [thread:$0]  (!%p2558_p11), %s2943_s2, 512, %s2562_s25, [#allocation6], %s2476_s29, %s2476_s29, %s2477_s30  }
  0x3e   : > { %s2617_s6 = sadd.s32 1, %s2470_s15   ;;  %s27_s8 = sadd.s32 1, %s2466_s14 }
  0x3f   : > { %s24_s7 = ssub.s32 %s2470_s15, %s2617_s6  ;;  %p34_p6 = scmp.ne.s32.totalorder %s2466_s14, %s2462_s13 }
  0x40   : > { %p25_p13 = scmp.eq.s32.totalorder %s24_s7, 0  ;;  %p35_p10 = scmp.eq.s32.totalorder %s2470_s15, 0 }
  0x41   : > { %p2952_p5 = scmp.eq.s32.totalorder %s2528_s16, 1  ;;  %p2137_p9 = scmp.lt.s32.totalorder %s2470_s15, 2 }
  0x42   : > { %s2626_s9 = scalar_select %p25_p13, %s2466_s14, %s27_s8  }
  0x43   : > { %p36_p3 = por %p35_p10, %p34_p6  ;;  %p2630_p7 = por %p2952_p5, %p34_p6 }
  0x44   : > { %s158_s23 = sand.u32 1, %s2466_s14   ;;  %s2106_s25 = smul.u32 3072, %s2470_s15 }
  0x45   : > { %s2953_s10 = scalar_select %p2630_p7, 1, 0 }
  0x46   : > { %s2105_s11 = smul.u32 192, %s158_s23  ;;  %p2637_p11 = pnand %p2137_p9, %p36_p3 }
  0x47   : > { %s2644_s26 = scalar_lea.hbm %s2941_s0, %s2106_s25  ;;  %s2648_s22 = scalar_lea.sflag [#allocation3], %s158_s23 }
  0x48   : > { %s162_s27 = scalar_lea.vmem [#allocation2], %s2105_s11  ;;  %s2370_s29 = scalar_lea.hbm %s2644_s26, 3072 }
  0x49   : > { %s170_s28 = sshll.u32 %s162_s27, 4  ;;  %p2371_p12 = scmp.ne.s32.totalorder %s2644_s26, %s2370_s29  ;;  %s2646_s28 = int_to_ptr.vmem [resolvable:$true] %s170_s28 }
  0x4a   : > { %p2372_p0 = pneg %p2637_p11  ;;  %s2375_s5 = scalar_lea.hbm %s2941_s0, 6144 }
  0x4b   : > { %p2376_p13 = scmp.lt.u32.totalorder %s2644_s26, %s2941_s0  ;;  %p2377_p6 = scmp.lt.u32.totalorder %s2375_s5, %s2370_s29 }
  0x4c   : > { %p2373_p2 = pnand %p2372_p0, %p2371_p12  ;;  %p2379_p3 = scmp.lt.u32.totalorder %s2370_s29, %s2644_s26 }
  0x4d   : > { %p2378_p10 = por %p2377_p6, %p2376_p13 }
  0x4e   : > { %p2374_p1 = pneg %p2373_p2 }
  0x4f   : > { %p2380_p5 = por %p2379_p3, %p2378_p10 }
  0x51   : > { %p2381_p9 = pnand %p2380_p5, %p2374_p1 }
  0x53   : > { %2384 = shalt.err (!%p2381_p9)
}
  0x54   : > { %s2385_s23 = scalar_lea.vmem %s2646_s28, 3072  ;;  %s2478_s11 = smov [#allocation2]  }
  0x55   : > { %p2386_p12 = scmp.ne.s32.totalorder %s2646_s28, %s2385_s23  ;;  %s2390_s25 = sshll.u32 %s2478_s11, 4  ;;  %s2391_s25 = int_to_ptr.vmem [resolvable:$false] %s2390_s25 }
  0x56   : > { %s2392_s21 = scalar_lea.vmem %s2391_s25, 6144  ;;  %p2393_p4 = scmp.lt.s32.totalorder %s2646_s28, %s2391_s25 }
  0x57   : > { %p2388_p2 = pnand %p2386_p12, %p2372_p0  ;;  %p2394_p13 = scmp.lt.s32.totalorder %s2392_s21, %s2385_s23 }
  0x59   : > { %p2389_p7 = pneg %p2388_p2  ;;  %p2395_p6 = por %p2394_p13, %p2393_p4 }
  0x5b   : > { %p2396_p10 = pnand %p2395_p6, %p2389_p7 }
  0x5d   : > { %2399 = shalt.err (!%p2396_p10)
}
  0x5e   : > { %s2479_s24 = smov 384   ;;  %s2480_s27 = smov 24  }
  0x5f   : > { %2130 = dma.hbm_to_vmem [thread:$0]  (!%p2637_p11), %s2644_s26, 3072, %s2646_s28, %s2648_s22, %s2479_s24, %s2479_s24, %s2480_s27  }
  0x60   : > { %182 = sbr.rel (%p2547_p8) target bundleno = 1378 (0x562), region = 32  ;;  %s2679_s29 = sand.u32 (!%p2547_p8), 1, %s2462_s13  }
  0x61   : > { %s2107_s30 = smul.u32 (!%p2547_p8), 192, %s2679_s29  ;;  %s185_s4 = scalar_lea.sflag (!%p2547_p8), [#allocation3], %s2679_s29 }
  0x62   : > { %p2955_p4 = scmp.ne.s32.totalorder (!%p2547_p8), %s2948_s18, 0 }
  0x63   : > { %s2683_s5 = scalar_lea.vmem (!%p2547_p8), [#allocation2], %s2107_s30 }
  0x67   : > { %2445 = dma.done.wait (%p2955_p4), %s185_s4, 3072  }
  0x68   : > { %2447 = vsyncadd (%p2955_p4), %s185_s4, 4294964224  ;;  %p2956_p7 = scmp.eq.s32.totalorder %s2528_s16, 0 }
  0x6a   : > { %2449 = dma.done.wait (%p2956_p7), [#allocation6], 9728   ;;  %p2957_p8 = pmov %p2956_p7 }
  0x6b   : > { %v2186_v0 = vld [vmem:[#allocation5 + $0x4] ss:$12 sps:$4 sm:$0xff]   ;;  %v2188_v1 = vld [vmem:[#allocation5] ss:$12 sps:$4 sm:$0xff]   ;;  %v2189_v2 = vld [vmem:[#allocation5 + $0x1c] ss:$12 sps:$4 sm:$0xff]  }
  0x6c   : > { %2451 = vsyncadd (%p2957_p8), [#allocation6], 4294957568  ;;  %737 = vmatprep.subr.bf16.mxu0 %v2186_v0  ;;  %v2191_v3 = vld [vmem:[#allocation5 + $0x18] ss:$12 sps:$4 sm:$0xff]   ;;  %v2192_v4 = vld [vmem:[#allocation5 + $0x34] ss:$12 sps:$4 sm:$0xff]  }
  0x6d   : > { %738 = vmatpush1.bf16.msra.mxu0 %v2188_v1  ;;  %v2194_v5 = vld [vmem:[#allocation5 + $0x30] ss:$12 sps:$4 sm:$0xff]   ;;  %v2195_v6 = vld [vmem:[#allocation5 + $0x4c] ss:$12 sps:$4 sm:$0xff]   ;;  %v2197_v7 = vld [vmem:[#allocation5 + $0x48] ss:$12 sps:$4 sm:$0xff]  }
  0x6e   : > { %739 = vmatprep.subr.bf16.mxu0 %v2189_v2  ;;  %v2198_v8 = vld [vmem:[#allocation5 + $0x64] ss:$12 sps:$4 sm:$0xff]   ;;  %v2200_v9 = vld [vmem:[#allocation5 + $0x60] ss:$12 sps:$4 sm:$0xff]   ;;  %v2201_v10 = vld [vmem:[#allocation5 + $0x7c] ss:$12 sps:$4 sm:$0xff]  }
  0x6f   : > { %v2203_v11 = vld [vmem:[#allocation5 + $0x78] ss:$12 sps:$4 sm:$0xff]   ;;  %v2204_v12 = vld [vmem:[#allocation5 + $0x94] ss:$12 sps:$4 sm:$0xff]   ;;  %v222_v13 = vld [vmem:[%s2683_s5 + $0x8] sm:$0xff]  ;;  %vm1127_vm0 = vcmask 261120  }
  0x70   : > { %v225_v14 = vld [vmem:[%s2683_s5 + $0x20] sm:$0xff]  ;;  %v2206_v16 = vld [vmem:[#allocation5 + $0x90] ss:$12 sps:$4 sm:$0xff]   ;;  %v2207_v17 = vld [vmem:[#allocation5 + $0xac] ss:$12 sps:$4 sm:$0xff]   ;;  %s2485_s18 = smov 64  }
  0x71   : > { %740 = vmatpush1.bf16.msra.mxu0 %v2191_v3  ;;  %v246_v15 = vpack.c.bf16 %v225_v14, %v222_v13  ;;  %v2209_v18 = vld [vmem:[#allocation5 + $0xa8] ss:$12 sps:$4 sm:$0xff]   ;;  %v2210_v19 = vld [vmem:[#allocation5 + $0xc4] ss:$12 sps:$4 sm:$0xff]   ;;  %v2212_v20 = vld [vmem:[#allocation5 + $0xc0] ss:$12 sps:$4 sm:$0xff]  }
  0x72   : > { %741 = vmatprep.subr.bf16.mxu0 %v2192_v4  ;;  %v2213_v21 = vld [vmem:[#allocation5 + $0xdc] ss:$12 sps:$4 sm:$0xff]   ;;  %v2215_v22 = vld [vmem:[#allocation5 + $0xd8] ss:$12 sps:$4 sm:$0xff]   ;;  %v2216_v23 = vld [vmem:[#allocation5 + $0xf4] ss:$12 sps:$4 sm:$0xff]  }
  0x73   : > { %769 = vmatprep.mubr.bf16.mxu0 %v246_v15  ;;  %915 = vmatprep.mubr.bf16.mxu1 %v246_v15  ;;  %v2218_v24 = vld [vmem:[#allocation5 + $0xf0] ss:$12 sps:$4 sm:$0xff]   ;;  %v2219_v25 = vld [vmem:[#allocation5 + $0x10c] ss:$12 sps:$4 sm:$0xff]   ;;  %v2258_v26 = vld [vmem:[#allocation5 + $0xc8] ss:$12 sps:$4 sm:$0xff]  }
  0x74   : > { %v2221_v27 = vld [vmem:[#allocation5 + $0x108] ss:$12 sps:$4 sm:$0xff]   ;;  %v2222_v29 = vld [vmem:[#allocation5 + $0x124] ss:$12 sps:$4 sm:$0xff]   ;;  %1965 = vmatprep.subr.bf16.mxu1 %v2258_v26  ;;  %v2260_v30 = vld [vmem:[#allocation5 + $0xe0] ss:$12 sps:$4 sm:$0xff]  }
  0x75   : > { %742 = vmatpush1.bf16.msra.mxu0 %v2194_v5  ;;  %v2259_v28 = vld [vmem:[#allocation5 + $0x8] ss:$12 sps:$4 sm:$0xff]   ;;  %v2261_v31 = vld [vmem:[#allocation5 + $0x20] ss:$12 sps:$4 sm:$0xff]   ;;  %v2262_v32 = vld [vmem:[#allocation5 + $0xf8] ss:$12 sps:$4 sm:$0xff]  }
  0x76   : > { %743 = vmatprep.subr.bf16.mxu0 %v2195_v6  ;;  %1966 = vmatpush3.bf16.msra.mxu1 %v2259_v28  ;;  %v2224_v33 = vld [vmem:[#allocation5 + $0x120] ss:$12 sps:$4 sm:$0xff]   ;;  %v2225_v34 = vld [vmem:[#allocation5 + $0x13c] ss:$12 sps:$4 sm:$0xff]   ;;  %v2263_v35 = vld [vmem:[#allocation5 + $0x38] ss:$12 sps:$4 sm:$0xff]  }
  0x77   : > { %1967 = vmatprep.subr.bf16.mxu1 %v2260_v30  ;;  %v2264_v36 = vld [vmem:[#allocation5 + $0x110] ss:$12 sps:$4 sm:$0xff]   ;;  %v2227_v37 = vld [vmem:[#allocation5 + $0x138] ss:$12 sps:$4 sm:$0xff]   ;;  %v2228_v38 = vld [vmem:[#allocation5 + $0x154] ss:$12 sps:$4 sm:$0xff]  }
  0x78   : > { %v2265_v39 = vld [vmem:[#allocation5 + $0x50] ss:$12 sps:$4 sm:$0xff]   ;;  %v2266_v40 = vld [vmem:[#allocation5 + $0x128] ss:$12 sps:$4 sm:$0xff]   ;;  %v2231_v42 = vld [vmem:[#allocation5 + $0x16c] ss:$12 sps:$4 sm:$0xff]  }
  0x79   : > { %744 = vmatpush1.bf16.msra.mxu0 %v2197_v7  ;;  %v2230_v41 = vld [vmem:[#allocation5 + $0x150] ss:$12 sps:$4 sm:$0xff]   ;;  %v2267_v43 = vld [vmem:[#allocation5 + $0x68] ss:$12 sps:$4 sm:$0xff]   ;;  %v2268_v44 = vld [vmem:[#allocation5 + $0x140] ss:$12 sps:$4 sm:$0xff]  }
  0x7a   : > { %745 = vmatprep.subr.bf16.mxu0 %v2198_v8  ;;  %1968 = vmatpush3.bf16.msra.mxu1 %v2261_v31  ;;  %v2233_v45 = vld [vmem:[#allocation5 + $0x168] ss:$12 sps:$4 sm:$0xff]   ;;  %v221_v46 = vld [vmem:[%s2683_s5] sm:$0xff]  ;;  %v224_v47 = vld [vmem:[%s2683_s5 + $0x18] sm:$0xff]  ;;  %v2481_v30 = vmov 0   ;;  %vm1658_vm1 = vcmask 523264  }
  0x7b   : > { %1969 = vmatprep.subr.bf16.mxu1 %v2262_v32  ;;  %v2236_v48 = vld [vmem:[#allocation5 + $0x184] ss:$12 sps:$4 sm:$0xff]   ;;  %v228_v49 = vld [vmem:[%s2683_s5 + $0x38] sm:$0xff]  ;;  %v2269_v51 = vld [vmem:[#allocation5 + $0x80] ss:$12 sps:$4 sm:$0xff]   ;;  %v245_v53 = vpack.c.bf16 %v224_v47, %v221_v46  ;;  %s1882_s20 = sshll.u32 %s2679_s29, 5 }
  0x7c   : > { %v231_v50 = vld [vmem:[%s2683_s5 + $0x50] sm:$0xff]  ;;  %v2270_v52 = vld [vmem:[#allocation5 + $0x158] ss:$12 sps:$4 sm:$0xff]   ;;  %v2234_v54 = vld [vmem:[#allocation5 + $0x180] ss:$12 sps:$4 sm:$0xff]   ;;  %s2862_s17 = scalar_lea.vmem [#allocation8], %s1882_s20 }
  0x7d   : > { %746 = vmatpush1.bf16.msra.mxu0 %v2200_v9  ;;  %v249_v55 = vpack.c.bf16 %v231_v50, %v228_v49  ;;  %v2239_v56 = vld [vmem:[#allocation5 + $0x19c] ss:$12 sps:$4 sm:$0xff]   ;;  %v2271_v57 = vld [vmem:[#allocation5 + $0x98] ss:$12 sps:$4 sm:$0xff]   ;;  %v227_v60 = vld [vmem:[%s2683_s5 + $0x30] sm:$0xff]  ;;  %s1964_s26 = sshll.u32 %s2528_s16, 9 }
  0x7e   : > { %747 = vmatprep.subr.bf16.mxu0 %v2201_v10  ;;  %1970 = vmatpush3.bf16.msra.mxu1 %v2263_v35  ;;  %v2272_v58 = vld [vmem:[#allocation5 + $0x170] ss:$12 sps:$4 sm:$0xff]   ;;  %v2237_v59 = vld [vmem:[#allocation5 + $0x198] ss:$12 sps:$4 sm:$0xff]   ;;  %v230_v61 = vld [vmem:[%s2683_s5 + $0x48] sm:$0xff]  ;;  %s1782_s28 = sshll.u32 %s2862_s17, 4  ;;  %s2896_s8 = scalar_lea.hbm %s2944_s3, %s1964_s26  ;;  %s2898_s28 = int_to_ptr.vmem [resolvable:$true] %s1782_s28 }
  0x7f   : > { %1971 = vmatprep.subr.bf16.mxu1 %v2264_v36  ;;  %v2242_v62 = vld [vmem:[#allocation5 + $0x1b4] ss:$12 sps:$4 sm:$0xff]   ;;  %v234_v63 = vld [vmem:[%s2683_s5 + $0x68] sm:$0xff]  ;;  %v2273_v1 = vld [vmem:[#allocation5 + $0xb0] ss:$12 sps:$4 sm:$0xff]   ;;  %v248_v3 = vpack.c.bf16 %v230_v61, %v227_v60  ;;  %s1768_s23 = scalar_lea.sflag [#allocation4], %s2679_s29 }
  0x80   : > { %v237_v0 = vld [vmem:[%s2683_s5 + $0x80] sm:$0xff]  ;;  %v2274_v2 = vld [vmem:[#allocation5 + $0x188] ss:$12 sps:$4 sm:$0xff]   ;;  %v2240_v4 = vld [vmem:[#allocation5 + $0x1b0] ss:$12 sps:$4 sm:$0xff]   ;;  %s2400_s16 = scalar_lea.vmem %s2898_s28, 512 }
  0x81   : > { %748 = vmatpush1.bf16.msra.mxu0 %v2203_v11  ;;  %v252_v5 = vpack.c.bf16 %v237_v0, %v234_v63  ;;  %v2245_v6 = vld [vmem:[#allocation5 + $0x1cc] ss:$12 sps:$4 sm:$0xff]   ;;  %v2243_v8 = vld [vmem:[#allocation5 + $0x1c8] ss:$12 sps:$4 sm:$0xff]   ;;  %v233_v9 = vld [vmem:[%s2683_s5 + $0x60] sm:$0xff]  ;;  %p2401_p11 = scmp.ne.s32.totalorder %s2898_s28, %s2400_s16  ;;  %p2958_p0 = scmp.ne.s32.totalorder %s2953_s10, 0 }
  0x82   : > { %749 = vmatprep.subr.bf16.mxu0 %v2204_v12  ;;  %1972 = vmatpush3.bf16.msra.mxu1 %v2265_v39  ;;  %v2275_v7 = vld [vmem:[#allocation5 + $0x1a0] ss:$12 sps:$4 sm:$0xff]   ;;  %v236_v10 = vld [vmem:[%s2683_s5 + $0x78] sm:$0xff]  ;;  %v2248_v11 = vld [vmem:[#allocation5 + $0x1e4] ss:$12 sps:$4 sm:$0xff]   ;;  %s2486_s11 = smov [#allocation8]  }
  0x83   : > { %1973 = vmatprep.subr.bf16.mxu1 %v2266_v40  ;;  %v240_v12 = vld [vmem:[%s2683_s5 + $0x98] sm:$0xff]  ;;  %v243_v13 = vld [vmem:[%s2683_s5 + $0xb0] sm:$0xff]  ;;  %v251_v14 = vpack.c.bf16 %v236_v10, %v233_v9  ;;  %v2279_v28 = vld [vmem:[#allocation5 + $0x200] ss:$12 sps:$4 sm:$0xff]   ;;  %p2402_p1 = pnand %p2401_p11, %p2958_p0  ;;  %s2404_s25 = sshll.u32 %s2486_s11, 4  ;;  %s2405_s25 = int_to_ptr.vmem [resolvable:$false] %s2404_s25 }
  0x84   : > { %v2276_v15 = vld [vmem:[#allocation5 + $0x1b8] ss:$12 sps:$4 sm:$0xff]   ;;  %v2252_v26 = vld [vmem:[#allocation5 + $0x210] ss:$12 sps:$4 sm:$0xff]   ;;  %v226_v32 = vld [vmem:[%s2683_s5 + $0x28] sm:$0xff]  ;;  %s2406_s21 = scalar_lea.vmem %s2405_s25, 1024  ;;  %p2407_p5 = scmp.lt.s32.totalorder %s2898_s28, %s2405_s25 }
  0x85   : > { %750 = vmatpush1.bf16.msra.mxu0 %v2206_v16  ;;  %v2246_v16 = vld [vmem:[#allocation5 + $0x1e0] ss:$12 sps:$4 sm:$0xff]   ;;  %v223_v31 = vld [vmem:[%s2683_s5 + $0x10] sm:$0xff]  ;;  %p2403_p3 = pneg %p2402_p1  ;;  %p2408_p9 = scmp.lt.s32.totalorder %s2406_s21, %s2400_s16 }
  0x86   : > { %751 = vmatprep.subr.bf16.mxu0 %v2207_v17  ;;  %1974 = vmatpush3.bf16.msra.mxu1 %v2267_v43  ;;  %v255_v17 = vpack.c.bf16 %v243_v13, %v240_v12  ;;  %v2281_v35 = vld [vmem:[#allocation5 + $0x230] ss:$12 sps:$4 sm:$0xff]   ;;  %v229_v36 = vld [vmem:[%s2683_s5 + $0x40] sm:$0xff]  ;;  %v238_v40 = vld [vmem:[%s2683_s5 + $0x88] sm:$0xff] }
  0x87   : > { %1975 = vmatprep.subr.bf16.mxu1 %v2268_v44  ;;  %v235_v39 = vld [vmem:[%s2683_s5 + $0x70] sm:$0xff]  ;;  %v244_v43 = vld [vmem:[%s2683_s5 + $0xb8] sm:$0xff]  ;;  %p2409_p12 = por %p2408_p9, %p2407_p5 }
  0x89   : > { %752 = vmatpush1.bf16.msra.mxu0 %v2209_v18  ;;  %v2251_v18 = vld [vmem:[#allocation5 + $0x1fc] ss:$12 sps:$4 sm:$0xff]   ;;  %p2410_p2 = pnand %p2409_p12, %p2403_p3 }
  0x8a   : > { %753 = vmatprep.subr.bf16.mxu0 %v2210_v19  ;;  %1976 = vmatpush3.bf16.msra.mxu1 %v2269_v51  ;;  %v2277_v19 = vld [vmem:[#allocation5 + $0x1d0] ss:$12 sps:$4 sm:$0xff]  }
  0x8b   : > { %1977 = vmatprep.subr.bf16.mxu1 %v2270_v52 }
  0x8d   : > { %754 = vmatpush1.bf16.msra.mxu0 %v2212_v20  ;;  %v2249_v20 = vld [vmem:[#allocation5 + $0x1f8] ss:$12 sps:$4 sm:$0xff]  }
  0x8e   : > { %755 = vmatprep.subr.bf16.mxu0 %v2213_v21  ;;  %1978 = vmatpush3.bf16.msra.mxu1 %v2271_v57  ;;  %v239_v21 = vld [vmem:[%s2683_s5 + $0x90] sm:$0xff] }
  0x8f   : > { %1979 = vmatprep.subr.bf16.mxu1 %v2272_v58 }
  0x91   : > { %756 = vmatpush1.bf16.msra.mxu0 %v2215_v22  ;;  %v242_v22 = vld [vmem:[%s2683_s5 + $0xa8] sm:$0xff] }
  0x92   : > { %757 = vmatprep.subr.bf16.mxu0 %v2216_v23  ;;  %1980 = vmatpush3.bf16.msra.mxu1 %v2273_v1  ;;  %v2254_v23 = vld [vmem:[#allocation5 + $0x214] ss:$12 sps:$4 sm:$0xff]  }
  0x93   : > { %2033 = vmatprep.subr.bf16.mxu1 %v2274_v2 }
  0x95   : > { %758 = vmatpush1.bf16.msra.mxu0 %v2218_v24  ;;  %916 = vmatmul.mubr.bf16.vlgmr.msra.gmra.mrb[0].mxu1 %v245_v53  ;;  %v254_v24 = vpack.c.bf16 %v242_v22, %v239_v21 }
  0x96   : > { %759 = vmatprep.subr.bf16.mxu0 %v2219_v25  ;;  %2034 = vmatpush3.bf16.msra.mxu1 %v2274_v2  ;;  %v2278_v25 = vld [vmem:[#allocation5 + $0x1e8] ss:$12 sps:$4 sm:$0xff]  }
  0x97   : > { %923 = vmatprep.mubr.bf16.mxu1 %v249_v55  ;;  %2035 = vmatprep.subr.bf16.mxu1 %v2275_v7 }
  0x99   : > { %760 = vmatpush1.bf16.msra.mxu0 %v2221_v27  ;;  %v2257_v27 = vld [vmem:[#allocation5 + $0x22c] ss:$12 sps:$4 sm:$0xff]  }
  0x9a   : > { %761 = vmatprep.subr.bf16.mxu0 %v2222_v29  ;;  %2036 = vmatpush3.bf16.msra.mxu1 %v2275_v7  ;;  %v2255_v29 = vld [vmem:[#allocation5 + $0x228] ss:$12 sps:$4 sm:$0xff]  }
  0x9b   : > { %2037 = vmatprep.subr.bf16.mxu1 %v2276_v15 }
  0x9d   : > { %762 = vmatpush1.bf16.msra.mxu0 %v2224_v33  ;;  %924 = vmatmul.mubr.bf16.gmra.mrb[4].mxu1 %v248_v3  ;;  %v247_v33 = vpack.c.bf16 %v226_v32, %v223_v31 }
  0x9e   : > { %763 = vmatprep.subr.bf16.mxu0 %v2225_v34  ;;  %2038 = vmatpush3.bf16.msra.mxu1 %v2276_v15  ;;  %v2280_v34 = vld [vmem:[#allocation5 + $0x218] ss:$12 sps:$4 sm:$0xff]  }
  0x9f   : > { %931 = vmatprep.mubr.bf16.mxu1 %v252_v5  ;;  %2039 = vmatprep.subr.bf16.mxu1 %v2277_v19 }
  0xa1   : > { %764 = vmatpush1.bf16.msra.mxu0 %v2227_v37  ;;  %v232_v37 = vld [vmem:[%s2683_s5 + $0x58] sm:$0xff] }
  0xa2   : > { %765 = vmatprep.subr.bf16.mxu0 %v2228_v38  ;;  %2040 = vmatpush3.bf16.msra.mxu1 %v2277_v19  ;;  %v250_v38 = vpack.c.bf16 %v232_v37, %v229_v36 }
  0xa3   : > { %2041 = vmatprep.subr.bf16.mxu1 %v2278_v25 }
  0xa5   : > { %766 = vmatpush1.bf16.msra.mxu0 %v2230_v41  ;;  %932 = vmatmul.mubr.bf16.gmra.mrb[8].mxu1 %v251_v14  ;;  %v253_v41 = vpack.c.bf16 %v238_v40, %v235_v39 }
  0xa6   : > { %767 = vmatprep.subr.bf16.mxu0 %v2231_v42  ;;  %2042 = vmatpush3.bf16.msra.mxu1 %v2278_v25  ;;  %v241_v42 = vld [vmem:[%s2683_s5 + $0xa0] sm:$0xff] }
  0xa7   : > { %939 = vmatprep.mubr.bf16.mxu1 %v255_v17  ;;  %2043 = vmatprep.subr.bf16.mxu1 %v2279_v28  ;;  %v256_v44 = vpack.c.bf16 %v244_v43, %v241_v42 }
  0xa9   : > { %768 = vmatpush1.bf16.msra.mxu0 %v2233_v45 }
  0xaa   : > { %810 = vmatprep.subr.bf16.mxu0 %v2236_v48  ;;  %2044 = vmatpush3.bf16.msra.mxu1 %v2279_v28 }
  0xab   : > { %2045 = vmatprep.subr.bf16.mxu1 %v2280_v34 }
  0xac   : > { %770 = vmatmul.mubr.bf16.vlgmr.msra.gmra.mrb[0].mxu0 %v245_v53 }
  0xad   : > { %811 = vmatpush1.bf16.msra.mxu0 %v2234_v54  ;;  %779 = vmatprep.mubr.bf16.mxu0 %v249_v55 }
  0xae   : > { %812 = vmatprep.subr.bf16.mxu0 %v2239_v56  ;;  %940 = vmatmul.mubr.bf16.gmra.mrb[12].mxu1 %v254_v24 }
  0xaf   : > { %2046 = vmatpush3.bf16.msra.mxu1 %v2280_v34  ;;  %2049 = vmatprep.mubr.bf16.mxu1 %v247_v33 }
  0xb0   : > { %2047 = vmatprep.subr.bf16.mxu1 %v2281_v35 }
  0xb1   : > { %813 = vmatpush1.bf16.msra.mxu0 %v2237_v59 }
  0xb2   : > { %814 = vmatprep.subr.bf16.mxu0 %v2242_v62 }
  0xb3   : > { %2048 = vmatpush3.bf16.msra.mxu1 %v2281_v35 }
  0xb4   : > { %780 = vmatmul.mubr.bf16.gmra.mrb[4].mxu0 %v248_v3 }
  0xb5   : > { %815 = vmatpush1.bf16.msra.mxu0 %v2240_v4  ;;  %789 = vmatprep.mubr.bf16.mxu0 %v252_v5 }
  0xb6   : > { %816 = vmatprep.subr.bf16.mxu0 %v2245_v6  ;;  %2050 = vmatmul.mubr.bf16.vlgmr.msra.gmra.mrb[16].mxu1 %v250_v38 }
  0xb7   : > { %2053 = vmatprep.mubr.bf16.mxu1 %v253_v41 }
  0xb9   : > { %817 = vmatpush1.bf16.msra.mxu0 %v2243_v8 }
  0xba   : > { %818 = vmatprep.subr.bf16.mxu0 %v2248_v11 }
  0xbc   : > { %790 = vmatmul.mubr.bf16.gmra.mrb[8].mxu0 %v251_v14 }
  0xbd   : > { %819 = vmatpush1.bf16.msra.mxu0 %v2246_v16  ;;  %799 = vmatprep.mubr.bf16.mxu0 %v255_v17 }
  0xbe   : > { %820 = vmatprep.subr.bf16.mxu0 %v2251_v18  ;;  %2054 = vmatmul.mubr.bf16.gmra.mrb[20].mxu1 %v256_v44 }
  0xc1   : > { %821 = vmatpush1.bf16.msra.mxu0 %v2249_v20 }
  0xc2   : > { %822 = vmatprep.subr.bf16.mxu0 %v2254_v23 }
  0xc4   : > { %800 = vmatmul.mubr.bf16.gmra.mrb[12].mxu0 %v254_v24 }
  0xc5   : > { %823 = vmatpush1.bf16.msra.mxu0 %v2252_v26  ;;  %842 = vmatprep.mubr.bf16.mxu0 %v2481_v30 }
  0xc6   : > { %824 = vmatprep.subr.bf16.mxu0 %v2257_v27 }
  0xc9   : > { %825 = vmatpush1.bf16.msra.mxu0 %v2255_v29 }
  0xcc   : > { %843 = vmatmul.mubr.bf16.vlgmr.msra.gmra.mrb[0].mxu0 %v247_v33 }
  0xcd   : > { %852 = vmatprep.mubr.bf16.mxu0 %v2481_v30 }
  0xd4   : > { %853 = vmatmul.mubr.bf16.gmra.mrb[4].mxu0 %v250_v38 }
  0xd5   : > { %862 = vmatprep.mubr.bf16.mxu0 %v2481_v30 }
  0xdc   : > { %863 = vmatmul.mubr.bf16.gmra.mrb[8].mxu0 %v253_v41 }
  0xdd   : > { %872 = vmatprep.mubr.bf16.mxu0 %v2481_v30 }
  0xe4   : > { %873 = vmatmul.mubr.bf16.gmra.mrb[12].mxu0 %v256_v44 }
 0x168   : > { %v1981_v45 = vpop.f32.mrb[0].mxu1 }
 0x169   : > { %v1982_v46 = vpop.f32.mrb[1].mxu1 }
 0x16a   : > { %v1983_v47 = vadd.f32 %v1982_v46, %v1981_v45  ;;  %v1984_v48 = vpop.f32.mrb[2].mxu1 }
 0x16b   : > { %v1985_v49 = vpop.f32.mrb[3].mxu1 }
 0x16c   : > { %v1986_v50 = vadd.f32 %v1985_v49, %v1984_v48  ;;  %v1027_v49 = vld [vmem:[#allocation7 + $0x10] sm:$0xff] }
 0x170   : > { %v1987_v51 = vpop.f32.mrb[4].mxu1 }
 0x171   : > { %v1988_v52 = vpop.f32.mrb[5].mxu1 }
 0x172   : > { %v1989_v53 = vadd.f32 %v1988_v52, %v1987_v51  ;;  %v1990_v54 = vpop.f32.mrb[6].mxu1  ;;  %v1028_v52 = vld [vmem:[#allocation7 + $0x18] sm:$0xff] }
 0x173   : > { %v1991_v55 = vpop.f32.mrb[7].mxu1 }
 0x174   : > { %v1992_v56 = vadd.f32 %v1991_v55, %v1990_v54  ;;  %v1026_v55 = vld [vmem:[#allocation7 + $0x8] sm:$0xff] }
 0x178   : > { %v1993_v57 = vpop.f32.mrb[8].mxu1 }
 0x179   : > { %v1994_v58 = vpop.f32.mrb[9].mxu1 }
 0x17a   : > { %v1995_v59 = vadd.f32 %v1994_v58, %v1993_v57  ;;  %v1996_v60 = vpop.f32.mrb[10].mxu1 }
 0x17b   : > { %v1997_v61 = vpop.f32.mrb[11].mxu1 }
 0x17c   : > { %v1998_v62 = vadd.f32 %v1997_v61, %v1996_v60 }
 0x181   : > { %v1999_v2 = vpop.f32.mrb[12].mxu1 }
 0x182   : > { %v2000_v5 = vpop.f32.mrb[13].mxu1 }
 0x183   : > { %v2001_v7 = vadd.f32 %v2000_v5, %v1999_v2  ;;  %v2002_v8 = vpop.f32.mrb[14].mxu1 }
 0x184   : > { %v2003_v9 = vpop.f32.mrb[15].mxu1 }
 0x185   : > { %v2004_v10 = vadd.f32 %v2003_v9, %v2002_v8 }
 0x189   : > { %v2051_v14 = vpop.f32.mrb[16].mxu1 }
 0x18a   : > { %v991_v17 = vadd.f32 %v2051_v14, %v1989_v53  ;;  %v982_v18 = vpop.f32.mrb[17].mxu1 }
 0x18b   : > { %v983_v20 = vadd.f32 %v1983_v47, %v982_v18  ;;  %v2052_v21 = vpop.f32.mrb[18].mxu1 }
 0x18c   : > { %v994_v22 = vadd.f32 %v2052_v21, %v1992_v56  ;;  %v985_v23 = vpop.f32.mrb[19].mxu1 }
 0x18d   : > { %v986_v24 = vadd.f32 %v1986_v50, %v985_v23  ;;  %v1025_v50 = vld [vmem:[#allocation7] sm:$0xff] }
 0x18e   : > { %v1022_v25 = vpack.c.bf16 %v994_v22, %v991_v17 }
 0x18f   : > { %v1021_v27 = vpack.c.bf16 %v986_v24, %v983_v20 }
 0x191   : > { %v2055_v30 = vpop.f32.mrb[20].mxu1 }
 0x192   : > { %v1007_v33 = vadd.f32 %v2055_v30, %v2001_v7  ;;  %v998_v34 = vpop.f32.mrb[21].mxu1 }
 0x193   : > { %v999_v36 = vadd.f32 %v1995_v59, %v998_v34  ;;  %v2056_v37 = vpop.f32.mrb[22].mxu1 }
 0x194   : > { %v1010_v38 = vadd.f32 %v2056_v37, %v2004_v10  ;;  %v1001_v39 = vpop.f32.mrb[23].mxu1 }
 0x195   : > { %v1002_v40 = vadd.f32 %v1998_v62, %v1001_v39 }
 0x196   : > { %v2717_v41 = vpack.c.bf16 %v1010_v38, %v1007_v33 }
 0x197   : > { %v2719_v43 = vpack.c.bf16 %v1002_v40, %v999_v36 }
 0x19f   : > { %v844_v63 = vpop.f32.mrb[0].mxu0 }
 0x1a0   : > { %v846_v0 = vpop.f32.mrb[1].mxu0 }
 0x1a1   : > { %v848_v1 = vpop.f32.mrb[2].mxu0 }
 0x1a2   : > { %v1013_v3 = vpack.c.bf16 %v848_v1, %v844_v63  ;;  %v850_v4 = vpop.f32.mrb[3].mxu0 }
 0x1a3   : > { %v1017_v6 = vpack.c.bf16 %v850_v4, %v846_v0 }
 0x1a4   : > { %2057 = vmatprep.subr.bf16.mxu1 %v1013_v3 }
 0x1a5   : > { %2058 = vmatpush3.bf16.xpose.msra.mxu1 %v1013_v3  ;;  %2061 = vmatprep.mubr.bf16.mxu1 %v1017_v6 }
 0x1a7   : > { %v854_v11 = vpop.f32.mrb[4].mxu0 }
 0x1a8   : > { %v856_v12 = vpop.f32.mrb[5].mxu0 }
 0x1a9   : > { %v858_v13 = vpop.f32.mrb[6].mxu0 }
 0x1aa   : > { %v1014_v15 = vpack.c.bf16 %v858_v13, %v854_v11  ;;  %v860_v16 = vpop.f32.mrb[7].mxu0 }
 0x1ab   : > { %v1018_v19 = vpack.c.bf16 %v860_v16, %v856_v12 }
 0x1ac   : > { %2059 = vmatprep.subr.bf16.mxu1 %v1014_v15 }
 0x1ad   : > { %2060 = vmatpush3.bf16.xpose.msra.mxu1 %v1014_v15 }
 0x1af   : > { %v864_v26 = vpop.f32.mrb[8].mxu0 }
 0x1b0   : > { %v866_v28 = vpop.f32.mrb[9].mxu0 }
 0x1b1   : > { %v868_v29 = vpop.f32.mrb[10].mxu0 }
 0x1b2   : > { %v1015_v31 = vpack.c.bf16 %v868_v29, %v864_v26  ;;  %v870_v32 = vpop.f32.mrb[11].mxu0 }
 0x1b3   : > { %v1019_v35 = vpack.c.bf16 %v870_v32, %v866_v28 }
 0x1b4   : > { %2062 = vmatmul.mubr.bf16.vlgmr.msra.gmra.mrb[24].mxu1 %v1018_v19  ;;  %2065 = vmatprep.subr.bf16.mxu1 %v1015_v31 }
 0x1b5   : > { %2066 = vmatpush3.bf16.xpose.msra.mxu1 %v1015_v31  ;;  %2069 = vmatprep.mubr.bf16.mxu1 %v1019_v35 }
 0x1b7   : > { %v874_v42 = vpop.f32.mrb[12].mxu0 }
 0x1b8   : > { %v876_v44 = vpop.f32.mrb[13].mxu0 }
 0x1b9   : > { %v878_v45 = vpop.f32.mrb[14].mxu0 }
 0x1ba   : > { %v1016_v46 = vpack.c.bf16 %v878_v45, %v874_v42  ;;  %v880_v47 = vpop.f32.mrb[15].mxu0 }
 0x1bb   : > { %v1020_v48 = vpack.c.bf16 %v880_v47, %v876_v44 }
 0x1bc   : > { %2067 = vmatprep.subr.bf16.mxu1 %v1016_v46 }
 0x1bd   : > { %2068 = vmatpush3.bf16.xpose.msra.mxu1 %v1016_v46 }
 0x1be   : > { %2073 = vmatprep.subr.bf16.mxu1 %v1021_v27 }
 0x1c4   : > { %2070 = vmatmul.mubr.bf16.vlgmr.msra.gmra.mrb[28].mxu1 %v1020_v48 }
 0x1c5   : > { %2074 = vmatpush3.bf16.msra.mxu1 %v1021_v27 }
 0x1c6   : > { %2075 = vmatprep.subr.bf16.mxu1 %v1022_v25 }
 0x1c9   : > { %2076 = vmatpush3.bf16.msra.mxu1 %v1022_v25 }
 0x1ca   : > { %2081 = vmatprep.subr.bf16.mxu1 %v2719_v43 }
 0x287   : > { %v2063_v51 = vpop.f32.mrb[24].mxu1 }
 0x288   : > { %v1072_v53 = vadd.f32 %v2063_v51, %v1027_v49  ;;  %v1063_v54 = vpop.f32.mrb[25].mxu1 }
 0x289   : > { %v1064_v56 = vadd.f32 %v1063_v54, %v1025_v50  ;;  %v2064_v57 = vpop.f32.mrb[26].mxu1 }
 0x28a   : > { %v1075_v58 = vadd.f32 %v2064_v57, %v1028_v52  ;;  %v1066_v59 = vpop.f32.mrb[27].mxu1  ;;  %v1134_v60 = vsel %vm1127_vm0, %v1072_v53, -inf }
 0x28b   : > { %v1067_v61 = vadd.f32 %v1066_v59, %v1026_v55  ;;  %1135 = vmax.xlane.f32.xlu1 %v1134_v60  ;;  %v1128_v62 = vsel %vm1127_vm0, %v1064_v56, -inf }
 0x28c   : > { %1129 = vmax.xlane.f32.xlu0 %v1128_v62  ;;  %v1137_v63 = vsel %vm1127_vm0, %v1075_v58, -inf }
 0x28d   : > { %v1131_v0 = vsel %vm1127_vm0, %v1067_v61, -inf }
 0x28f   : > { %1138 = vmax.xlane.f32.xlu1 %v1137_v63 }
 0x290   : > { %1132 = vmax.xlane.f32.xlu0 %v1131_v0 }
 0x297   : > { %v2071_v1 = vpop.f32.mrb[28].mxu1 }
 0x298   : > { %v1112_v2 = vpop.f32.mrb[29].mxu1  ;;  %v1121_v6 = vadd.f32 %v2071_v1, %v1027_v49 }
 0x299   : > { %v1113_v3 = vadd.f32 %v1112_v2, %v1025_v50  ;;  %v2072_v4 = vpop.f32.mrb[30].mxu1 }
 0x29a   : > { %v1115_v5 = vpop.f32.mrb[31].mxu1  ;;  %v1124_v9 = vadd.f32 %v2072_v4, %v1028_v52  ;;  %v1146_v11 = vsel %vm1127_vm0, %v1121_v6, -inf }
 0x29b   : > { %v1116_v7 = vadd.f32 %v1115_v5, %v1026_v55  ;;  %v1140_v8 = vsel %vm1127_vm0, %v1113_v3, -inf }
 0x29c   : > { %1141 = vmax.xlane.f32.xlu0 %v1140_v8  ;;  %v1149_v12 = vsel %vm1127_vm0, %v1124_v9, -inf }
 0x29d   : > { %v1143_v10 = vsel %vm1127_vm0, %v1116_v7, -inf }
 0x29e   : > { %1144 = vmax.xlane.f32.xlu1 %v1143_v10 }
 0x2a0   : > { %1147 = vmax.xlane.f32.xlu0 %v1146_v11 }
 0x2a2   : > { %1150 = vmax.xlane.f32.xlu1 %v1149_v12 }
 0x318   : > { %v1136_v13 = vpop.xlane.xlu1 %1135 }
 0x319   : > { %v1154_v14 = vsub.f32 %v1072_v53, %v1136_v13  ;;  %v1130_v15 = vpop.xlane.xlu0 %1129 }
 0x31a   : > { %v1152_v16 = vsub.f32 %v1064_v56, %v1130_v15 }
 0x31b   : > { %v1164_v17 = vmul.f32 1.442695, %v1154_v14 }
 0x31c   : > { %v1160_v18 = vmul.f32 1.442695, %v1152_v16  ;;  %v1139_v19 = vpop.xlane.xlu1 %1138 }
 0x31d   : > { %v1155_v20 = vsub.f32 %v1075_v58, %v1139_v19  ;;  %v1133_v21 = vpop.xlane.xlu0 %1132 }
 0x31e   : > { %2282 = vpow2.f32 %v1160_v18  ;;  %v1153_v22 = vsub.f32 %v1067_v61, %v1133_v21 }
 0x31f   : > { %2284 = vpow2.f32 %v1164_v17  ;;  %v1166_v23 = vmul.f32 1.442695, %v1155_v20  ;;  %v2482_v20 = vmov 1983009808  }
 0x320   : > { %v1162_v24 = vmul.f32 1.442695, %v1153_v22  ;;  %v1332_v21 = vunpack.c.l.s4 %v2482_v20  ;;  %v1334_v22 = vlaneseq }
 0x322   : > { %2286 = vpow2.f32 %v1162_v24 }
 0x323   : > { %2288 = vpow2.f32 %v1166_v23 }
 0x328   : > { %v2283_v25 = vpop.eup %2282 }
 0x329   : > { %v1142_v26 = vpop.xlane.xlu0 %1141  ;;  %v1176_v27 = vsel %vm1127_vm0, %v2283_v25, 0.0  ;;  %v2285_v28 = vpop.eup %2284 }
 0x32a   : > { %v1156_v29 = vsub.f32 %v1113_v3, %v1142_v26  ;;  %1177 = vadd.xlane.f32.xlu0 %v1176_v27  ;;  %v1182_v36 = vsel %vm1127_vm0, %v2285_v28, 0.0  ;;  %v2483_v26 = vmov 1934713408  }
 0x32b   : > { %v1145_v30 = vpop.xlane.xlu1 %1144  ;;  %v1363_v27 = vunpack.c.l.s4 %v2483_v26 }
 0x32c   : > { %v2287_v31 = vpop.eup %2286  ;;  %v1168_v32 = vmul.f32 1.442695, %v1156_v29  ;;  %v1157_v33 = vsub.f32 %v1116_v7, %v1145_v30  ;;  %v2484_v29 = vmov 0.0  }
 0x32d   : > { %v1148_v34 = vpop.xlane.xlu0 %1147  ;;  %v1179_v35 = vsel %vm1127_vm0, %v2287_v31, 0.0  ;;  %v2289_v37 = vpop.eup %2288 }
 0x32e   : > { %2290 = vpow2.f32 %v1168_v32  ;;  %v1170_v38 = vmul.f32 1.442695, %v1157_v33  ;;  %v1158_v39 = vsub.f32 %v1121_v6, %v1148_v34  ;;  %1180 = vadd.xlane.f32.xlu1 %v1179_v35  ;;  %1183 = vadd.xlane.f32.xlu0 %v1182_v36  ;;  %v1185_v45 = vsel %vm1127_vm0, %v2289_v37, 0.0 }
 0x32f   : > { %v1151_v40 = vpop.xlane.xlu1 %1150 }
 0x330   : > { %2292 = vpow2.f32 %v1170_v38  ;;  %v1172_v42 = vmul.f32 1.442695, %v1158_v39  ;;  %v1159_v44 = vsub.f32 %v1124_v9, %v1151_v40 }
 0x332   : > { %2294 = vpow2.f32 %v1172_v42  ;;  %v1174_v46 = vmul.f32 1.442695, %v1159_v44  ;;  %1186 = vadd.xlane.f32.xlu1 %v1185_v45 }
 0x334   : > { %2296 = vpow2.f32 %v1174_v46 }
 0x338   : > { %v2291_v47 = vpop.eup %2290 }
 0x339   : > { %v1188_v48 = vsel %vm1127_vm0, %v2291_v47, 0.0 }
 0x33a   : > { %v2293_v49 = vpop.eup %2292  ;;  %1189 = vadd.xlane.f32.xlu0 %v1188_v48 }
 0x33b   : > { %v1191_v50 = vsel %vm1127_vm0, %v2293_v49, 0.0 }
 0x33c   : > { %v2295_v51 = vpop.eup %2294  ;;  %1192 = vadd.xlane.f32.xlu1 %v1191_v50 }
 0x33d   : > { %v1194_v52 = vsel %vm1127_vm0, %v2295_v51, 0.0 }
 0x33e   : > { %v2297_v53 = vpop.eup %2296  ;;  %1195 = vadd.xlane.f32.xlu0 %v1194_v52 }
 0x33f   : > { %v1197_v54 = vsel %vm1127_vm0, %v2297_v53, 0.0 }
 0x340   : > { %1198 = vadd.xlane.f32.xlu1 %v1197_v54 }
 0x3b7   : > { %v1178_v55 = vpop.xlane.xlu0 %1177 }
 0x3b8   : > { %2298 = vrcp.f32 %v1178_v55 }
 0x3bb   : > { %v1181_v56 = vpop.xlane.xlu1 %1180  ;;  %v1184_v57 = vpop.xlane.xlu0 %1183 }
 0x3bc   : > { %2300 = vrcp.f32 %v1181_v56 }
 0x3bd   : > { %2302 = vrcp.f32 %v1184_v57 }
 0x3bf   : > { %v1187_v58 = vpop.xlane.xlu1 %1186 }
 0x3c0   : > { %2304 = vrcp.f32 %v1187_v58 }
 0x3c2   : > { %v2299_v59 = vpop.eup %2298 }
 0x3c3   : > { %v1208_v62 = vmul.f32 %v2299_v59, %v2283_v25  ;;  %v1335_v25 = vshrl.u32 %v1334_v22, 7 }
 0x3c6   : > { %v2301_v60 = vpop.eup %2300 }
 0x3c7   : > { %v1190_v61 = vpop.xlane.xlu0 %1189  ;;  %v1209_v63 = vmul.f32 %v2301_v60, %v2287_v31  ;;  %v2303_v0 = vpop.eup %2302  ;;  %v1364_v31 = vunpack.c.0.s8 %v1363_v27 }
 0x3c8   : > { %2306 = vrcp.f32 %v1190_v61  ;;  %v1210_v4 = vmul.f32 %v2303_v0, %v2285_v28 }
 0x3c9   : > { %v1193_v1 = vpop.xlane.xlu1 %1192  ;;  %v1216_v2 = vpack.c.bf16 %v1209_v63, %v1208_v62  ;;  %v2753_v38 = vsub.s32 %v1364_v31, %v1335_v25 }
 0x3ca   : > { %v2305_v3 = vpop.eup %2304  ;;  %2308 = vrcp.f32 %v1193_v1 }
 0x3cb   : > { %v1211_v5 = vmul.f32 %v2305_v3, %v2289_v37  ;;  %2077 = vmatprep.mubr.msk.bf16.mxu1 %vm1127_vm0, %v1216_v2  ;;  %v1196_v6 = vpop.xlane.xlu0 %1195 }
 0x3cc   : > { %2310 = vrcp.f32 %v1196_v6 }
 0x3cd   : > { %v1199_v7 = vpop.xlane.xlu1 %1198  ;;  %v1217_v8 = vpack.c.bf16 %v1211_v5, %v1210_v4 }
 0x3ce   : > { %2312 = vrcp.f32 %v1199_v7 }
 0x3cf   : > { %2078 = vmatmul.mubr.msk.bf16.vlgmr.msra.gmra.mrb[32].mxu1 %vm1127_vm0, %v1217_v8 }
 0x3d0   : > { %2082 = vmatpush3.bf16.msra.mxu1 %v2719_v43 }
 0x3d1   : > { %2083 = vmatprep.subr.bf16.mxu1 %v2717_v41 }
 0x3d2   : > { %v2307_v9 = vpop.eup %2306 }
 0x3d3   : > { %v1212_v11 = vmul.f32 %v2307_v9, %v2291_v47 }
 0x3d4   : > { %v2309_v10 = vpop.eup %2308  ;;  %2084 = vmatpush3.bf16.msra.mxu1 %v2717_v41  ;;  %v1333_v41 = vunpack.c.0.s8 %v1332_v21 }
 0x3d5   : > { %v1213_v12 = vmul.f32 %v2309_v10, %v2293_v49 }
 0x3d6   : > { %v2311_v13 = vpop.eup %2310  ;;  %v2745_v28 = vsub.s32 %v1333_v41, %v1335_v25 }
 0x3d7   : > { %v1218_v14 = vpack.c.bf16 %v1213_v12, %v1212_v11  ;;  %v1214_v16 = vmul.f32 %v2311_v13, %v2295_v51 }
 0x3d8   : > { %v2313_v15 = vpop.eup %2312 }
 0x3d9   : > { %v1215_v17 = vmul.f32 %v2313_v15, %v2297_v53  ;;  %2085 = vmatprep.mubr.msk.bf16.mxu1 %vm1127_vm0, %v1218_v14 }
 0x3db   : > { %v1219_v18 = vpack.c.bf16 %v1215_v17, %v1214_v16 }
 0x3dd   : > { %2086 = vmatmul.mubr.msk.bf16.vlgmr.msra.gmra.mrb[36].mxu1 %vm1127_vm0, %v1219_v18 }
 0x4a2   : > { %v2079_v19 = vpop.f32.mrb[32].mxu1 }
 0x4a3   : > { %v1260_v43 = vpop.f32.mrb[33].mxu1  ;;  %v1462_v30 = vcombine.high %v2079_v19, %v2484_v29  ;;  %v1469_v34 = vrot.slane %v2079_v19, %v2745_v28 }
 0x4a4   : > { %v2080_v23 = vpop.f32.mrb[34].mxu1  ;;  %v1330_v32 = vcombine.high %v1260_v43, %v2484_v29  ;;  %v1337_v36 = vrot.slane %v1260_v43, %v2745_v28 }
 0x4a5   : > { %v1263_v24 = vpop.f32.mrb[35].mxu1  ;;  %v1528_v33 = vcombine.high %v2080_v23, %v2484_v29  ;;  %v1476_v35 = vrot.slane %v1462_v30, %v2745_v28  ;;  %v1535_v40 = vrot.slane %v2080_v23, %v2745_v28 }
 0x4a6   : > { %v2756_v39 = vrot.slane %v1330_v32, %v2745_v28  ;;  %v1396_v47 = vcombine.high %v1263_v24, %v2484_v29  ;;  %v1403_v8 = vrot.slane %v1263_v24, %v2745_v28 }
 0x4a7   : > { %v2762_v46 = vrot.slane %v1528_v33, %v2745_v28 }
 0x4a8   : > { %v1410_v12 = vrot.slane %v1396_v47, %v2745_v28 }
 0x4b0   : > { %v2087_v37 = vpop.f32.mrb[36].mxu1 }
 0x4b1   : > { %v1477_v42 = vcombine.high %v2087_v37, %v2484_v29  ;;  %v1484_v44 = vrot.slane %v2087_v37, %v2745_v28  ;;  %v1315_v45 = vpop.f32.mrb[37].mxu1 }
 0x4b2   : > { %v1345_v48 = vcombine.high %v1315_v45, %v2484_v29  ;;  %v1352_v49 = vrot.slane %v1315_v45, %v2745_v28  ;;  %v2088_v50 = vpop.f32.mrb[38].mxu1 }
 0x4b3   : > { %v1491_v51 = vrot.slane %v1477_v42, %v2745_v28  ;;  %v1492_v52 = vcombine.low %v1469_v34, %v1484_v44  ;;  %v1493_v53 = vcombine.high %v1469_v34, %v1484_v44  ;;  %v1543_v54 = vcombine.high %v2088_v50, %v2484_v29  ;;  %v1318_v55 = vpop.f32.mrb[39].mxu1 }
 0x4b4   : > { %v1359_v56 = vrot.slane %v1345_v48, %v2745_v28  ;;  %v1360_v57 = vcombine.low %v1337_v36, %v1352_v49  ;;  %v1361_v58 = vcombine.high %v1337_v36, %v1352_v49  ;;  %v1550_v59 = vrot.slane %v2088_v50, %v2745_v28 }
 0x4b5   : > { %v2772_v60 = vrot.slane %v1492_v52, %v2753_v38  ;;  %v2775_v61 = vrot.slane %v1493_v53, %v2753_v38  ;;  %v1508_v62 = vcombine.low %v1476_v35, %v1491_v51  ;;  %v1509_v63 = vcombine.high %v1476_v35, %v1491_v51 }
 0x4b6   : > { %v2778_v0 = vrot.slane %v1360_v57, %v2753_v38  ;;  %v2781_v1 = vrot.slane %v1361_v58, %v2753_v38  ;;  %v1376_v2 = vcombine.low %v2756_v39, %v1359_v56  ;;  %v1377_v3 = vcombine.high %v2756_v39, %v1359_v56 }
 0x4b7   : > { %v1557_v4 = vrot.slane %v1543_v54, %v2745_v28  ;;  %v1558_v5 = vcombine.low %v1535_v40, %v1550_v59  ;;  %v1559_v6 = vcombine.high %v1535_v40, %v1550_v59  ;;  %v1411_v7 = vcombine.high %v1318_v55, %v2484_v29 }
 0x4b8   : > { %v1418_v9 = vrot.slane %v1318_v55, %v2745_v28  ;;  %v1525_v10 = vcombine.high %v2775_v61, %v2484_v29  ;;  %v1524_v11 = vcombine.high %v2772_v60, %v2484_v29  ;;  %v1393_v18 = vcombine.high %v2781_v1, %v2484_v29 }
 0x4b9   : > { %v1574_v13 = vcombine.low %v2762_v46, %v1557_v4  ;;  %v1575_v14 = vcombine.high %v2762_v46, %v1557_v4  ;;  %v1425_v15 = vrot.slane %v1411_v7, %v2745_v28  ;;  %v1392_v19 = vcombine.high %v2778_v0, %v2484_v29 }
 0x4ba   : > { %v1426_v16 = vcombine.low %v1403_v8, %v1418_v9  ;;  %v1427_v17 = vcombine.high %v1403_v8, %v1418_v9  ;;  %1631 = vrot.lane.b32.xlu1 %v1525_v10, %s2485_s18  ;;  %1627 = vrot.lane.b32.xlu0 %v1524_v11, %s2485_s18  ;;  %v1523_v21 = vrot.slane %v1509_v63, %v2753_v38 }
 0x4bb   : > { %v1442_v43 = vcombine.low %v1410_v12, %v1425_v15  ;;  %v1443_v20 = vcombine.high %v1410_v12, %v1425_v15  ;;  %v1516_v22 = vrot.slane %v1508_v62, %v2753_v38  ;;  %v2808_v23 = vrot.slane %v1558_v5, %v2753_v38 }
 0x4bc   : > { %v2811_v24 = vrot.slane %v1559_v6, %v2753_v38  ;;  %v1527_v41 = vcombine.high %v1523_v21, %v2484_v29  ;;  %v2818_v26 = vrot.slane %v1426_v16, %v2753_v38  ;;  %v1384_v31 = vrot.slane %v1376_v2, %v2753_v38 }
 0x4bd   : > { %v1526_v25 = vcombine.high %v1516_v22, %v2484_v29  ;;  %v1590_v30 = vcombine.high %v2808_v23, %v2484_v29  ;;  %v1391_v34 = vrot.slane %v1377_v3, %v2753_v38  ;;  %v1450_v35 = vrot.slane %v1442_v43, %v2753_v38 }
 0x4be   : > { %1599 = vrot.lane.b32.xlu1 %v1393_v18, %s2485_s18  ;;  %1595 = vrot.lane.b32.xlu0 %v1392_v19, %s2485_s18  ;;  %v1591_v27 = vcombine.high %v2811_v24, %v2484_v29  ;;  %v1394_v32 = vcombine.high %v1384_v31, %v2484_v29  ;;  %v1458_v33 = vcombine.high %v2818_v26, %v2484_v29 }
 0x4bf   : > { %v1441_v36 = vrot.slane %v1427_v17, %v2753_v38  ;;  %v1395_v37 = vcombine.high %v1391_v34, %v2484_v29  ;;  %v1460_v39 = vcombine.high %v1450_v35, %v2484_v29  ;;  %v2838_v40 = vrot.slane %v1574_v13, %v2753_v38 }
 0x4c0   : > { %v1457_v45 = vrot.slane %v1443_v20, %v2753_v38  ;;  %v1589_v47 = vrot.slane %v1575_v14, %v2753_v38 }
 0x4c1   : > { %v1459_v42 = vcombine.high %v1441_v36, %v2484_v29  ;;  %v1592_v44 = vcombine.high %v2838_v40, %v2484_v29 }
 0x4c2   : > { %1639 = vrot.lane.b32.xlu1 %v1527_v41, %s2485_s18  ;;  %1635 = vrot.lane.b32.xlu0 %v1526_v25, %s2485_s18  ;;  %v1461_v46 = vcombine.high %v1457_v45, %v2484_v29  ;;  %v1593_v48 = vcombine.high %v1589_v47, %v2484_v29 }
 0x4c6   : > { %1647 = vrot.lane.b32.xlu1 %v1591_v27, %s2485_s18  ;;  %1643 = vrot.lane.b32.xlu0 %v1590_v30, %s2485_s18 }
 0x4ca   : > { %1603 = vrot.lane.b32.xlu1 %v1394_v32, %s2485_s18  ;;  %1611 = vrot.lane.b32.xlu0 %v1458_v33, %s2485_s18 }
 0x4ce   : > { %1607 = vrot.lane.b32.xlu1 %v1395_v37, %s2485_s18  ;;  %1619 = vrot.lane.b32.xlu0 %v1460_v39, %s2485_s18 }
 0x4d2   : > { %1615 = vrot.lane.b32.xlu1 %v1459_v42, %s2485_s18  ;;  %1651 = vrot.lane.b32.xlu0 %v1592_v44, %s2485_s18 }
 0x4d6   : > { %1623 = vrot.lane.b32.xlu1 %v1461_v46, %s2485_s18 }
 0x4da   : > { %1655 = vrot.lane.b32.xlu1 %v1593_v48, %s2485_s18 }
 0x52c   : > { %v1632_v49 = vpop.permute.xlu1 %1631  ;;  %v1628_v50 = vpop.permute.xlu0 %1627 }
 0x52d   : > { %v1668_v53 = vsel %vm1658_vm1, %v2775_v61, %v1632_v49  ;;  %v1667_v54 = vsel %vm1658_vm1, %v2772_v60, %v1628_v50 }
 0x52e   : > { %v1725_v55 = vcombine.low %v1667_v54, %v1668_v53 }
 0x530   : > { %v1600_v51 = vpop.permute.xlu1 %1599  ;;  %v1596_v52 = vpop.permute.xlu0 %1595  ;;  %v1733_v59 = vrot.slane %v1725_v55, %v2745_v28 }
 0x531   : > { %v1660_v61 = vsel %vm1658_vm1, %v2781_v1, %v1600_v51  ;;  %v1659_v4 = vsel %vm1658_vm1, %v2778_v0, %v1596_v52 }
 0x532   : > { %v1691_v6 = vcombine.low %v1659_v4, %v1660_v61 }
 0x534   : > { %v1640_v38 = vpop.permute.xlu1 %1639  ;;  %v1636_v56 = vpop.permute.xlu0 %1635  ;;  %v1699_v11 = vrot.slane %v1691_v6, %v2745_v28 }
 0x535   : > { %v1670_v57 = vsel %vm1658_vm1, %v1523_v21, %v1640_v38  ;;  %v1669_v29 = vsel %vm1658_vm1, %v1516_v22, %v1636_v56 }
 0x536   : > { %v1726_v58 = vcombine.low %v1669_v29, %v1670_v57 }
 0x538   : > { %v1740_v62 = vrot.slane %v1726_v58, %v2745_v28  ;;  %v1648_v63 = vpop.permute.xlu1 %1647  ;;  %v1644_v2 = vpop.permute.xlu0 %1643 }
 0x539   : > { %v1672_v18 = vsel %vm1658_vm1, %v2811_v24, %v1648_v63  ;;  %v1671_v19 = vsel %vm1658_vm1, %v2808_v23, %v1644_v2 }
 0x53a   : > { %v1741_v3 = vcombine.low %v1733_v59, %v1740_v62  ;;  %v1742_v41 = vcombine.low %v1671_v19, %v1672_v18 }
 0x53c   : > { %1765 = vst [vmem:[%s2862_s17 + $0x10] sm:$0xff] %v1741_v3  ;;  %v1604_v60 = vpop.permute.xlu1 %1603  ;;  %v1612_v5 = vpop.permute.xlu0 %1611  ;;  %v1750_v32 = vrot.slane %v1742_v41, %v2745_v28 }
 0x53d   : > { %v1661_v8 = vsel %vm1658_vm1, %v1384_v31, %v1604_v60  ;;  %v1663_v0 = vsel %vm1658_vm1, %v2818_v26, %v1612_v5 }
 0x540   : > { %v1608_v7 = vpop.permute.xlu1 %1607  ;;  %v1620_v13 = vpop.permute.xlu0 %1619 }
 0x541   : > { %v1662_v9 = vsel %vm1658_vm1, %v1391_v34, %v1608_v7  ;;  %v1665_v43 = vsel %vm1658_vm1, %v1450_v35, %v1620_v13 }
 0x542   : > { %v1692_v10 = vcombine.low %v1661_v8, %v1662_v9 }
 0x544   : > { %v1706_v12 = vrot.slane %v1692_v10, %v2745_v28  ;;  %v1616_v14 = vpop.permute.xlu1 %1615  ;;  %v1652_v21 = vpop.permute.xlu0 %1651 }
 0x545   : > { %v1664_v15 = vsel %vm1658_vm1, %v1441_v36, %v1616_v14  ;;  %v1673_v24 = vsel %vm1658_vm1, %v2838_v40, %v1652_v21 }
 0x546   : > { %v1707_v1 = vcombine.low %v1699_v11, %v1706_v12  ;;  %v1708_v16 = vcombine.low %v1663_v0, %v1664_v15 }
 0x548   : > { %1763 = vst [vmem:[%s2862_s17] sm:$0xff] %v1707_v1  ;;  %v1624_v17 = vpop.permute.xlu1 %1623  ;;  %v1716_v25 = vrot.slane %v1708_v16, %v2745_v28 }
 0x549   : > { %v1666_v20 = vsel %vm1658_vm1, %v1457_v45, %v1624_v17 }
 0x54a   : > { %v1709_v22 = vcombine.low %v1665_v43, %v1666_v20 }
 0x54c   : > { %v1723_v26 = vrot.slane %v1709_v22, %v2745_v28  ;;  %v1656_v27 = vpop.permute.xlu1 %1655 }
 0x54d   : > { %v1674_v23 = vsel %vm1658_vm1, %v1589_v47, %v1656_v27 }
 0x54e   : > { %v1724_v30 = vcombine.low %v1716_v25, %v1723_v26  ;;  %v1743_v31 = vcombine.low %v1673_v24, %v1674_v23 }
 0x550   : > { %1764 = vst [vmem:[%s2862_s17 + $0x8] sm:$0xff] %v1724_v30  ;;  %v1757_v33 = vrot.slane %v1743_v31, %v2745_v28 }
 0x552   : > { %v1758_v34 = vcombine.low %v1750_v32, %v1757_v33 }
 0x554   : > { %1766 = vst [vmem:[%s2862_s17 + $0x18] sm:$0xff] %v1758_v34 }
 0x555   : > { %2413 = shalt.err (!%p2410_p2)
}
 0x556   : > { %s2414_s24 = scalar_lea.hbm %s2896_s8, 512  ;;  %s2418_s30 = scalar_lea.hbm %s2944_s3, 1024 }
 0x557   : > { %p2415_p13 = scmp.ne.s32.totalorder %s2896_s8, %s2414_s24  ;;  %p2419_p4 = scmp.lt.u32.totalorder %s2896_s8, %s2944_s3 }
 0x558   : > { %p2420_p7 = scmp.lt.u32.totalorder %s2418_s30, %s2414_s24  ;;  %p2422_p11 = scmp.lt.u32.totalorder %s2414_s24, %s2896_s8 }
 0x559   : > { %p2416_p6 = pnand %p2415_p13, %p2958_p0 }
 0x55a   : > { %p2421_p8 = por %p2420_p7, %p2419_p4 }
 0x55b   : > { %p2417_p10 = pneg %p2416_p6 }
 0x55c   : > { %p2423_p1 = por %p2422_p11, %p2421_p8 }
 0x55e   : > { %p2424_p3 = pnand %p2423_p1, %p2417_p10 }
 0x560   : > { %2427 = shalt.err (!%p2424_p3)
}
 0x561   : > { %2118 = dma.vmem_to_hbm [thread:$0]  (%p2958_p0), %s2898_s28, 512, %s2896_s8, %s1768_s23  }
 0x562 PF: > { %s1794_s18 = sand.u32 1, %s2458_s12   ;;  %p2959_p5 = scmp.ne.s32.totalorder %s2949_s19, 0 }
 0x563   : > { %p2960_p9 = scmp.ge.s32.totalorder %s2470_s15, 2  ;;  %s1795_s20 = scalar_lea.sflag [#allocation4], %s1794_s18 }
 0x565   : > { %p2132_p12 = pnand %p2960_p9, %p2959_p5 }
 0x567   : > { %2453 = dma.done.wait (!%p2132_p12), %s1795_s20, 512  }
 0x568   : > { %2455 = vsyncadd (!%p2132_p12), %s1795_s20, 4294966784  ;;  %p17_p2 = scmp.ge.s32.totalorder %s2617_s6, 4   ;;  %s2961_s12 = smov %s2462_s13 }
 0x569   : > { %s2962_s13 = smov %s2466_s14  ;;  %s2963_s14 = smov %s2626_s9 }
 0x56a   : > { %s2964_s15 = smov %s2617_s6  ;;  %19 = sbr.rel (!%p17_p2) target bundleno = 6 (0x6), region = 85 }
 0x571   :  { %1800 = vsyncpa [#allocation3], 1 }
 0x572   :  { %1802 = vsyncpa [#allocation3 + $0x1], 1 }
 0x573   :  { %1803 = vsyncpa [#allocation6], 1 }
 0x574   :  { %1804 = vsyncpa [#allocation4], 1 }
 0x575   :  { %1806 = vsyncpa [#allocation4 + $0x1], 1 }

</bundles_post_ra>
